<compile_context>
chip_gen: v7x
topology: tpu7x:2x2x1
jax: 0.10.0
libtpu: 0.0.40
codegen_flags: <defaults>
</compile_context>

<pallas_src>
import functools

import jax
import jax.numpy as jnp
from jax.experimental import pallas as pl
from jax.experimental.pallas import tpu as pltpu


def _round_up(n, m):
    return ((n + m - 1) // m) * m


def _rgcn_layer_kernel(a_ref, x_ref, w_ref, dsrc_ref, ddst_ref, bsum_ref, o_ref,
                       *, apply_relu, xw_first):
    """One HeteroGraphConv(GraphConv, aggregate='sum') layer.

    Grid = (dst_tile i [parallel], relation r [arbitrary, reduction]).

    a_ref    (1, t_dst, n_src_p)   raw adjacency tile for relation r (bf16)
    x_ref    (n_src_p, f_in_p)     source features (bf16)
    w_ref    (1, f_in_p, f_out_p)  per-relation GraphConv weight (bf16)
    dsrc_ref (1, 1, n_src_p)       deg_src^{-1/2} for relation r (bf16)
    ddst_ref (1, t_dst, 1)         deg_dst^{-1/2} for relation r (bf16)
    bsum_ref (1, f_out_p)          sum_r bias_r (f32)
    o_ref    (t_dst, f_out_p)      f32 output tile, resident accumulator over r
    """
    r = pl.program_id(1)

    @pl.when(r == 0)
    def _init():
        o_ref[...] = jnp.zeros_like(o_ref)

    # Fused norm='both': scale adjacency columns by deg_src^{-1/2} (cheap
    # sublane broadcast on the VPU); dst-side scaling applied after the matmuls.
    a = a_ref[0] * dsrc_ref[0]                                   # (t_dst, n_src_p)
    if xw_first:
        xw = jnp.dot(x_ref[...], w_ref[0], preferred_element_type=jnp.float32)
        msg = jnp.dot(a, xw.astype(a.dtype), preferred_element_type=jnp.float32)
    else:  # (A @ X) @ W — cheaper when tiling dst (no per-tile X@W recompute)
        ax = jnp.dot(a, x_ref[...], preferred_element_type=jnp.float32)
        msg = jnp.dot(ax.astype(a.dtype), w_ref[0],
                      preferred_element_type=jnp.float32)

    # Per-relation dst-side normalization, then aggregate='sum' over relations.
    o_ref[...] += msg * ddst_ref[0].astype(jnp.float32)

    @pl.when(r == pl.num_programs(1) - 1)
    def _finalize():
        res = o_ref[...] + bsum_ref[...]       # bias hoisted out of the r-loop
        if apply_relu:
            res = jnp.maximum(res, 0.0)
        o_ref[...] = res


def hetero_graph_conv(a, x, w, b, *, apply_relu, t_dst_max=256):
    """sum_r GraphConv_r(A_r, X) (+ optional fused ReLU) via one pallas_call.

    a: (R, n_dst, n_src) raw (un-normalized, dense) adjacency per relation
    x: (n_src, f_in), w: (R, f_in, f_out), b: (R, f_out)
    Returns (n_dst, f_out) f32.
    """
    R, n_dst, n_src = a.shape
    f_in, f_out = w.shape[1], w.shape[2]

    # (8,128)-aligned, lane-dense padded extents.
    f_in_p = _round_up(f_in, 128)
    f_out_p = _round_up(f_out, 128)
    n_src_p = _round_up(n_src, 128)
    t_dst = min(_round_up(n_dst, 8), t_dst_max)
    n_dst_p = _round_up(n_dst, t_dst)
    n_tiles = n_dst_p // t_dst

    # Degrees (DGL norm='both', clamp to 1) computed once from the raw A.
    a32 = a.astype(jnp.float32)
    dsrc = jnp.maximum(a32.sum(axis=1), 1.0) ** -0.5          # (R, n_src)
    ddst = jnp.maximum(a32.sum(axis=2), 1.0) ** -0.5          # (R, n_dst)

    cd = jnp.bfloat16  # MXU-native compute dtype; accumulation stays f32
    a_p = jnp.zeros((R, n_dst_p, n_src_p), cd).at[:, :n_dst, :n_src].set(a.astype(cd))
    x_p = jnp.zeros((n_src_p, f_in_p), cd).at[:n_src, :f_in].set(x.astype(cd))
    w_p = jnp.zeros((R, f_in_p, f_out_p), cd).at[:, :f_in, :f_out].set(w.astype(cd))
    dsrc_p = jnp.ones((R, 1, n_src_p), jnp.float32).at[:, 0, :n_src].set(dsrc).astype(cd)
    ddst_p = jnp.ones((R, n_dst_p, 1), jnp.float32).at[:, :n_dst, 0].set(ddst).astype(cd)
    bsum_p = jnp.zeros((1, f_out_p), jnp.float32).at[0, :f_out].set(
        b.astype(jnp.float32).sum(axis=0))

    # Matmul association flag (in 128-granular padded units both orders tie;
    # tie broken toward (A@X)@W to avoid recomputing X@W per dst tile).
    xw_first = f_out_p < f_in_p

    kernel = functools.partial(
        _rgcn_layer_kernel, apply_relu=apply_relu, xw_first=xw_first)

    out_p = pl.pallas_call(
        kernel,
        out_shape=jax.ShapeDtypeStruct((n_dst_p, f_out_p), jnp.float32),
        grid_spec=pltpu.PrefetchScalarGridSpec(
            num_scalar_prefetch=0,
            grid=(n_tiles, R),  # relation (reduction) axis last
            in_specs=[
                pl.BlockSpec((1, t_dst, n_src_p), lambda i, r: (r, i, 0)),
                pl.BlockSpec((n_src_p, f_in_p), lambda i, r: (0, 0)),
                pl.BlockSpec((1, f_in_p, f_out_p), lambda i, r: (r, 0, 0)),
                pl.BlockSpec((1, 1, n_src_p), lambda i, r: (r, 0, 0)),
                pl.BlockSpec((1, t_dst, 1), lambda i, r: (r, i, 0)),
                pl.BlockSpec((1, f_out_p), lambda i, r: (0, 0)),
            ],
            out_specs=pl.BlockSpec((t_dst, f_out_p), lambda i, r: (i, 0)),
        ),
        compiler_params=pltpu.CompilerParams(
            dimension_semantics=("parallel", "arbitrary"),
            vmem_limit_bytes=32 * 1024 * 1024,  # safe on v5e/v6e/v7x
        ),
    )(a_p, x_p, w_p, dsrc_p, ddst_p, bsum_p)

    return out_p[:n_dst, :f_out]


def rgcn_forward(blocks, inputs, conv1_params, conv2_params):
    """blocks = (A0, A1) with A_i of shape (R, n_dst_i, n_src_i)."""
    a0, a1 = blocks
    w1, b1 = conv1_params
    w2, b2 = conv2_params
    h = hetero_graph_conv(a0, inputs, w1, b1, apply_relu=True)   # conv1 + ReLU
    h = hetero_graph_conv(a1, h, w2, b2, apply_relu=False)       # conv2
    return h


def _symmetric_norm(a):
    deg_src = jnp.maximum(a.sum(axis=1), 1.0)
    deg_dst = jnp.maximum(a.sum(axis=2), 1.0)
    return a * (deg_dst[:, :, None] ** -0.5) * (deg_src[:, None, :] ** -0.5)


def _reference_forward(blocks, inputs, conv1_params, conv2_params):
    """Pure-JAX f32 reference for validation."""
    a0, a1 = _symmetric_norm(blocks[0]), _symmetric_norm(blocks[1])
    w1, b1 = conv1_params
    w2, b2 = conv2_params
    h1 = jnp.einsum("rds,sf,rfo->do", a0, inputs, w1) + b1.sum(0)
    h1 = jnp.maximum(h1, 0.0)
    h2 = jnp.einsum("rds,sf,rfo->do", a1, h1, w2) + b2.sum(0)
    return h2


if __name__ == "__main__":
    key = jax.random.PRNGKey(0)
    ks = jax.random.split(key, 8)

    # small synthetic heterogeneous graph: 3 relations, single node type,
    # two message-flow blocks (64 -> 32 -> 16 nodes)
    R = 3
    N0, N1, N2 = 64, 32, 16
    in_feats, hid_feats, out_feats = 8, 16, 8

    a0 = (jax.random.uniform(ks[0], (R, N1, N0)) < 0.3).astype(jnp.float32)
    a1 = (jax.random.uniform(ks[1], (R, N2, N1)) < 0.3).astype(jnp.float32)
    x = jax.random.normal(ks[2], (N0, in_feats), jnp.float32)

    # deterministic parameter init (shapes from RGCN.__init__)
    w1 = 0.1 * jax.random.normal(ks[3], (R, in_feats, hid_feats), jnp.float32)
    b1 = 0.1 * jax.random.normal(ks[4], (R, hid_feats), jnp.float32)
    w2 = 0.1 * jax.random.normal(ks[5], (R, hid_feats, out_feats), jnp.float32)
    b2 = 0.1 * jax.random.normal(ks[6], (R, out_feats), jnp.float32)

    out = rgcn_forward((a0, a1), x, (w1, b1), (w2, b2))
    jax.block_until_ready(out)
    assert out.shape == (N2, out_feats)

    ref = _reference_forward((a0, a1), x, (w1, b1), (w2, b2))
    # bf16 matmul operands with f32 accumulation -> loosened tolerance vs f32 ref
    assert jnp.allclose(out, ref, atol=2e-2, rtol=2e-2), "mismatch vs reference"

    print("KERNEL_OK")
</pallas_src>

<mosaic_0001>
module attributes {stable_mosaic.version = 11 : i64} {
  func.func @_rgcn_layer_kernel(%arg0: i32, %arg1: i32, %arg2: memref<1x32x128xbf16, #tpu.memory_space<vmem>>, %arg3: memref<128x128xbf16, #tpu.memory_space<vmem>>, %arg4: memref<1x128x128xbf16, #tpu.memory_space<vmem>>, %arg5: memref<1x1x128xbf16, #tpu.memory_space<vmem>>, %arg6: memref<1x32x1xbf16, #tpu.memory_space<vmem>>, %arg7: memref<1x128xf32, #tpu.memory_space<vmem>>, %arg8: memref<32x128xf32, #tpu.memory_space<vmem>>) attributes {dimension_semantics = [#tpu.dimension_semantics<parallel>, #tpu.dimension_semantics<arbitrary>], iteration_bounds = array<i64: 1, 3>, scalar_prefetch = 0 : i64, scratch_operands = 0 : i64, tpu.core_type = #tpu.core_type<tc>, window_params = [{transform_indices = @transform_0, window_bounds = array<i64: 1, 32, 128>}, {pipeline_mode = #tpu.pipeline_mode<synchronous>, transform_indices = @transform_1, window_bounds = array<i64: 128, 128>}, {transform_indices = @transform_2, window_bounds = array<i64: 1, 128, 128>}, {transform_indices = @transform_3, window_bounds = array<i64: 1, 1, 128>}, {transform_indices = @transform_4, window_bounds = array<i64: 1, 32, 1>}, {pipeline_mode = #tpu.pipeline_mode<synchronous>, transform_indices = @transform_5, window_bounds = array<i64: 1, 128>}, {transform_indices = @transform_6, window_bounds = array<i64: 32, 128>}]} {
    %c0_i32 = arith.constant 0 : i32
    %0 = arith.cmpi eq, %arg1, %c0_i32 : i32
    %1 = arith.extui %0 : i1 to i32
    %c0_i32_0 = arith.constant 0 : i32
    %2 = arith.cmpi ne, %1, %c0_i32_0 : i32
    scf.if %2 {
      %cst_20 = arith.constant 0.000000e+00 : f32
      %26 = vector.broadcast %cst_20 : f32 to vector<32x128xf32>
      %c0_21 = arith.constant 0 : index
      %c0_22 = arith.constant 0 : index
      %27 = vector.load %arg8[%c0_21, %c0_22] : memref<32x128xf32, #tpu.memory_space<vmem>>, vector<32x128xf32>
      tpu.vector_store %arg8[%c0_21, %c0_22], %26 {strides = array<i32>} : memref<32x128xf32, #tpu.memory_space<vmem>>, vector<32x128xf32>,
    } else {
    }
    %c0 = arith.constant 0 : index
    %c0_1 = arith.constant 0 : index
    %c0_2 = arith.constant 0 : index
    %3 = vector.load %arg2[%c0, %c0_1, %c0_2] : memref<1x32x128xbf16, #tpu.memory_space<vmem>>, vector<1x32x128xbf16>
    %4 = vector.shape_cast %3 : vector<1x32x128xbf16> to vector<32x128xbf16>
    %c0_3 = arith.constant 0 : index
    %c0_4 = arith.constant 0 : index
    %c0_5 = arith.constant 0 : index
    %5 = vector.load %arg5[%c0_3, %c0_4, %c0_5] : memref<1x1x128xbf16, #tpu.memory_space<vmem>>, vector<1x1x128xbf16>
    %6 = vector.shape_cast %5 : vector<1x1x128xbf16> to vector<1x128xbf16>
    %7 = vector.broadcast %6 : vector<1x128xbf16> to vector<32x128xbf16>
    %8 = arith.mulf %4, %7 : vector<32x128xbf16>
    %c0_6 = arith.constant 0 : index
    %c0_7 = arith.constant 0 : index
    %9 = vector.load %arg3[%c0_6, %c0_7] : memref<128x128xbf16, #tpu.memory_space<vmem>>, vector<128x128xbf16>
    %cst = arith.constant dense<0.000000e+00> : vector<32x128xf32>
    %10 = tpu.matmul %8, %9, %cst {dimension_numbers = #tpu.dot_dimension_numbers<[1], [0], [0], [1], [0, 0, 1, 1], [], []>} : vector<32x128xbf16>, vector<128x128xbf16>, vector<32x128xf32> -> vector<32x128xf32>
    %11 = arith.truncf %10 : vector<32x128xf32> to vector<32x128xbf16>
    %c0_8 = arith.constant 0 : index
    %c0_9 = arith.constant 0 : index
    %c0_10 = arith.constant 0 : index
    %12 = vector.load %arg4[%c0_8, %c0_9, %c0_10] : memref<1x128x128xbf16, #tpu.memory_space<vmem>>, vector<1x128x128xbf16>
    %13 = vector.shape_cast %12 : vector<1x128x128xbf16> to vector<128x128xbf16>
    %cst_11 = arith.constant dense<0.000000e+00> : vector<32x128xf32>
    %14 = tpu.matmul %11, %13, %cst_11 {dimension_numbers = #tpu.dot_dimension_numbers<[1], [0], [0], [1], [0, 0, 1, 1], [], []>} : vector<32x128xbf16>, vector<128x128xbf16>, vector<32x128xf32> -> vector<32x128xf32>
    %c0_12 = arith.constant 0 : index
    %c0_13 = arith.constant 0 : index
    %15 = vector.load %arg8[%c0_12, %c0_13] : memref<32x128xf32, #tpu.memory_space<vmem>>, vector<32x128xf32>
    %c0_14 = arith.constant 0 : index
    %c0_15 = arith.constant 0 : index
    %c0_16 = arith.constant 0 : index
    %16 = vector.load %arg6[%c0_14, %c0_15, %c0_16] : memref<1x32x1xbf16, #tpu.memory_space<vmem>>, vector<1x32x1xbf16>
    %17 = vector.shape_cast %16 : vector<1x32x1xbf16> to vector<32x1xbf16>
    %18 = arith.extf %17 : vector<32x1xbf16> to vector<32x1xf32>
    %19 = vector.broadcast %18 : vector<32x1xf32> to vector<32x128xf32>
    %20 = arith.mulf %14, %19 : vector<32x128xf32>
    %21 = arith.addf %15, %20 : vector<32x128xf32>
    %c0_17 = arith.constant 0 : index
    %c0_18 = arith.constant 0 : index
    %22 = vector.load %arg8[%c0_17, %c0_18] : memref<32x128xf32, #tpu.memory_space<vmem>>, vector<32x128xf32>
    tpu.vector_store %arg8[%c0_17, %c0_18], %21 {strides = array<i32>} : memref<32x128xf32, #tpu.memory_space<vmem>>, vector<32x128xf32>,
    %c2_i32 = arith.constant 2 : i32
    %23 = arith.cmpi eq, %arg1, %c2_i32 : i32
    %24 = arith.extui %23 : i1 to i32
    %c0_i32_19 = arith.constant 0 : i32
    %25 = arith.cmpi ne, %24, %c0_i32_19 : i32
    scf.if %25 {
      %c0_20 = arith.constant 0 : index
      %c0_21 = arith.constant 0 : index
      %26 = vector.load %arg8[%c0_20, %c0_21] : memref<32x128xf32, #tpu.memory_space<vmem>>, vector<32x128xf32>
      %c0_22 = arith.constant 0 : index
      %c0_23 = arith.constant 0 : index
      %27 = vector.load %arg7[%c0_22, %c0_23] : memref<1x128xf32, #tpu.memory_space<vmem>>, vector<1x128xf32>
      %28 = vector.broadcast %27 : vector<1x128xf32> to vector<32x128xf32>
      %29 = arith.addf %26, %28 : vector<32x128xf32>
      %cst_24 = arith.constant 0.000000e+00 : f32
      %30 = vector.broadcast %cst_24 : f32 to vector<32x128xf32>
      %31 = arith.maximumf %29, %30 : vector<32x128xf32>
      %c0_25 = arith.constant 0 : index
      %c0_26 = arith.constant 0 : index
      %32 = vector.load %arg8[%c0_25, %c0_26] : memref<32x128xf32, #tpu.memory_space<vmem>>, vector<32x128xf32>
      tpu.vector_store %arg8[%c0_25, %c0_26], %31 {strides = array<i32>} : memref<32x128xf32, #tpu.memory_space<vmem>>, vector<32x128xf32>,
    } else {
    }
    return
  }
  func.func @transform_0(%arg0: i32, %arg1: i32) -> (i32, i32, i32) {
    %c0_i32 = arith.constant 0 : i32
    %c0_i32_0 = arith.constant 0 : i32
    return %arg1, %arg0, %c0_i32 : i32, i32, i32
  }
  func.func @transform_1(%arg0: i32, %arg1: i32) -> (i32, i32) {
    %c0_i32 = arith.constant 0 : i32
    %c0_i32_0 = arith.constant 0 : i32
    %c0_i32_1 = arith.constant 0 : i32
    return %c0_i32, %c0_i32_0 : i32, i32
  }
  func.func @transform_2(%arg0: i32, %arg1: i32) -> (i32, i32, i32) {
    %c0_i32 = arith.constant 0 : i32
    %c0_i32_0 = arith.constant 0 : i32
    %c0_i32_1 = arith.constant 0 : i32
    return %arg1, %c0_i32, %c0_i32_0 : i32, i32, i32
  }
  func.func @transform_3(%arg0: i32, %arg1: i32) -> (i32, i32, i32) {
    %c0_i32 = arith.constant 0 : i32
    %c0_i32_0 = arith.constant 0 : i32
    %c0_i32_1 = arith.constant 0 : i32
    return %arg1, %c0_i32, %c0_i32_0 : i32, i32, i32
  }
  func.func @transform_4(%arg0: i32, %arg1: i32) -> (i32, i32, i32) {
    %c0_i32 = arith.constant 0 : i32
    %c0_i32_0 = arith.constant 0 : i32
    return %arg1, %arg0, %c0_i32 : i32, i32, i32
  }
  func.func @transform_5(%arg0: i32, %arg1: i32) -> (i32, i32) {
    %c0_i32 = arith.constant 0 : i32
    %c0_i32_0 = arith.constant 0 : i32
    %c0_i32_1 = arith.constant 0 : i32
    return %c0_i32, %c0_i32_0 : i32, i32
  }
  func.func @transform_6(%arg0: i32, %arg1: i32) -> (i32, i32) {
    %c0_i32 = arith.constant 0 : i32
    %c0_i32_0 = arith.constant 0 : i32
    return %arg0, %c0_i32 : i32, i32
  }
}

</mosaic_0001>

<bundles_post_ra>
// kernel: tpu_custom_call.1
= control target key start
LH: loop header
LB: loop body
LE: loop exit
PB: predicated region body
PF: predicated region fallthrough
CT: control target
= control target key end

     0   :  { %11 = vsyncpa [#allocation3], 0  ;;  %s1478_s0 = inlined_call_operand.vmem [shape: bf16[3,32,128], index: 0, kind: input, shape index: {}]   ;;  %s1479_s1 = inlined_call_operand.hbm [shape: bf16[128,128], index: 1, kind: input, shape index: {}]   ;;  %s1480_s2 = inlined_call_operand.hbm [shape: bf16[3,128,128], index: 2, kind: input, shape index: {}]   ;;  %s1481_s3 = inlined_call_operand.vmem [shape: bf16[3,1,128], index: 3, kind: input, shape index: {}]   ;;  %s1482_s4 = inlined_call_operand.vmem [shape: bf16[3,32,1], index: 4, kind: input, shape index: {}]   ;;  %s1483_s5 = inlined_call_operand.vmem [shape: f32[1,128], index: 5, kind: input, shape index: {}]   ;;  %s1484_s6 = inlined_call_operand.hbm [shape: f32[32,128], index: 6, kind: output, shape index: {}]  }
   0x1   :  { %12 = vsyncpa [#allocation6], 0 }
   0x2   :  { %14 = vsyncpa [#allocation6 + $0x1], 0 }
   0x3   :  { %15 = vsyncpa [#allocation4], 0  ;;  %s1253_s21 = smov 0   ;;  %s1255_s22 = smov 0  }
   0x4   :  { %s1257_s23 = smov 0   ;;  %s1259_s24 = smov 0  }
   0x5   :  { %s1261_s25 = smov 0   ;;  %s1263_s26 = smov 0  }
   0x6 LB: > { %s847_s27 = sadd.s32 4294967295, %s1207_s26   ;;  %p102_p0 = scmp.ne.s32.totalorder %s1191_s22, %s1187_s21  ;;  %s1207_s26 = sphi %s1263_s26, %s21_s26   ;;  %s1203_s25 = sphi %s1261_s25, %s1502_s25   ;;  %s1199_s24 = sphi %s1259_s24, %s1501_s24   ;;  %s1195_s23 = sphi %s1257_s23, %s1500_s23   ;;  %s1191_s22 = sphi %s1255_s22, %s1499_s22   ;;  %s1187_s21 = sphi %s1253_s21, %s1498_s21  }
   0x7   : > { %p1285_p1 = scmp.eq.s32.totalorder %s847_s27, 0  ;;  %p848_p2 = scmp.ge.s32.totalorder %s1207_s26, 1 }
   0x8   : > { %p214_p3 = scmp.lt.s32.totalorder %s1207_s26, 4  ;;  %s1209_s7 = smov [#allocation2]  }
   0x9   : > { %s1489_s28 = scalar_select %p1285_p1, 1, 0 }
   0xa   : > { %p1293_p4 = por %p1285_p1, %p102_p0  ;;  %p1297_p5 = pnand %p848_p2, %p214_p3 }
   0xb   : > { %s226_s8 = sshll.u32 %s1209_s7, 4  ;;  %s30_s10 = sadd.s32 1, %s1203_s25  ;;  %s227_s8 = int_to_ptr.vmem [resolvable:$true] %s226_s8 }
   0xc   : > { %s1490_s29 = scalar_select %p1293_p4, 1, 0 }
   0xd   : > { %s1491_s30 = scalar_select %p1297_p5, 1, 0 }
   0xe   : > { %p969_p6 = pneg %p1297_p5  ;;  %s1065_s13 = scalar_lea.hbm %s1479_s1, 1024 }
   0xf   : > { %p1066_p8 = scmp.ne.s32.totalorder %s1479_s1, %s1065_s13  ;;  %p1072_p12 = scmp.lt.u32.totalorder %s1065_s13, %s1479_s1 }
  0x10   : > { %p1305_p7 = pnand %p969_p6, %p1285_p1 }
  0x12   : > { %p1067_p9 = pneg %p1305_p7 }
  0x14   : > { %p1068_p10 = pnand %p1067_p9, %p1066_p8 }
  0x16   : > { %p1069_p11 = pneg %p1068_p10 }
  0x18   : > { %p1074_p13 = pnand %p1072_p12, %p1069_p11 }
  0x1a   : > { %1077 = shalt.err (!%p1074_p13)
}
  0x1b   : > { %s1078_s18 = scalar_lea.vmem %s227_s8, 1024  ;;  %p1086_p6 = scmp.lt.s32.totalorder %s227_s8, %s227_s8 }
  0x1c   : > { %p1079_p0 = scmp.ne.s32.totalorder %s227_s8, %s1078_s18  ;;  %p1087_p4 = scmp.lt.s32.totalorder %s1078_s18, %s1078_s18 }
  0x1e   : > { %p1081_p2 = pnand %p1079_p0, %p1067_p9  ;;  %p1088_p1 = por %p1087_p4, %p1086_p6 }
  0x20   : > { %p1082_p3 = pneg %p1081_p2 }
  0x22   : > { %p1089_p5 = pnand %p1088_p1, %p1082_p3 }
  0x24   : > { %1092 = shalt.err (!%p1089_p5)
}
  0x25   : > { %s1210_s19 = smov 64   ;;  %s1211_s20 = smov 4  }
  0x26   : > { %972 = dma.hbm_to_vmem [thread:$0]  (!%p1305_p7), %s1479_s1, 1024, %s227_s8, [#allocation3], %s1210_s19, %s1210_s19, %s1211_s20  }
  0x27   : > { %p31_p1 = scmp.ge.s32.totalorder %s30_s10, 3  ;;  %s89_s11 = sadd.s32 1, %s1195_s23 }
  0x28   : > { %p96_p4 = scmp.ne.s32.totalorder %s1195_s23, %s1191_s22  ;;  %p97_p5 = scmp.eq.s32.totalorder %s1207_s26, 0 }
  0x29   : > { %s1504_s10 = smov (%p31_p1, %s30_s10), 0  ;;  %p978_p9 = scmp.lt.s32.totalorder %s1207_s26, 3 }
  0x2a   : > { %p98_p8 = por %p97_p5, %p96_p4  ;;  %s86_s12 = ssub.s32 %s1203_s25, %s1504_s10 }
  0x2b   : > { %s256_s13 = sand.u32 1, %s1195_s23   ;;  %p87_p10 = scmp.eq.s32.totalorder %s86_s12, 0 }
  0x2c   : > { %s851_s9 = sshll.u32 %s256_s13, 6  ;;  %s887_s14 = sshll.u32 %s1203_s25, 10 }
  0x2d   : > { %s1341_s15 = scalar_select %p87_p10, %s1195_s23, %s89_s11  }
  0x2e   : > { %s1346_s8 = scalar_lea.hbm %s1480_s2, %s887_s14  ;;  %s260_s18 = scalar_lea.vmem [#allocation5], %s851_s9 }
  0x2f   : > { %s267_s21 = sshll.u32 %s260_s18, 4  ;;  %p1348_p7 = pnand %p978_p9, %p98_p8  ;;  %s1352_s21 = int_to_ptr.vmem [resolvable:$true] %s267_s21 }
  0x30   : > { %s1354_s11 = scalar_lea.sflag [#allocation6], %s256_s13  ;;  %s1093_s12 = scalar_lea.hbm %s1346_s8, 1024 }
  0x31   : > { %p1094_p11 = scmp.ne.s32.totalorder %s1346_s8, %s1093_s12  ;;  %p1095_p12 = pneg %p1348_p7 }
  0x32   : > { %s1098_s16 = scalar_lea.hbm %s1480_s2, 3072  ;;  %p1099_p2 = scmp.lt.u32.totalorder %s1346_s8, %s1480_s2 }
  0x33   : > { %p1096_p13 = pnand %p1095_p12, %p1094_p11  ;;  %p1100_p3 = scmp.lt.u32.totalorder %s1098_s16, %s1093_s12 }
  0x34   : > { %p1102_p1 = scmp.lt.u32.totalorder %s1093_s12, %s1346_s8 }
  0x35   : > { %p1097_p0 = pneg %p1096_p13  ;;  %p1101_p6 = por %p1100_p3, %p1099_p2 }
  0x37   : > { %p1103_p4 = por %p1102_p1, %p1101_p6 }
  0x39   : > { %p1104_p5 = pnand %p1103_p4, %p1097_p0 }
  0x3b   : > { %1107 = shalt.err (!%p1104_p5)
}
  0x3c   : > { %s1108_s13 = scalar_lea.vmem %s1352_s21, 1024  ;;  %s1212_s9 = smov [#allocation5]  }
  0x3d   : > { %p1109_p8 = scmp.ne.s32.totalorder %s1352_s21, %s1108_s13  ;;  %s1113_s14 = sshll.u32 %s1212_s9, 4  ;;  %s1114_s14 = int_to_ptr.vmem [resolvable:$false] %s1113_s14 }
  0x3e   : > { %s1115_s17 = scalar_lea.vmem %s1114_s14, 2048  ;;  %p1116_p11 = scmp.lt.s32.totalorder %s1352_s21, %s1114_s14 }
  0x3f   : > { %p1111_p9 = pnand %p1109_p8, %p1095_p12  ;;  %p1117_p13 = scmp.lt.s32.totalorder %s1115_s17, %s1108_s13 }
  0x41   : > { %p1112_p10 = pneg %p1111_p9  ;;  %p1118_p2 = por %p1117_p13, %p1116_p11 }
  0x43   : > { %p1119_p3 = pnand %p1118_p2, %p1112_p10 }
  0x45   : > { %1122 = shalt.err (!%p1119_p3)
}
  0x46   : > { %976 = dma.hbm_to_vmem [thread:$0]  (!%p1348_p7), %s1346_s8, 1024, %s1352_s21, %s1354_s11, %s1210_s19, %s1210_s19, %s1211_s20  }
  0x47   : > { %p1494_p12 = scmp.ne.s32.totalorder %s1491_s30, 0 }
  0x48   : > { %p1495_p0 = scmp.ne.s32.totalorder (!%p1494_p12), %s1489_s28, 0 }
  0x49   : > { %298 = sbr.rel (%p1494_p12) target bundleno = 604 (0x25c), region = 44 }
  0x50   : > { %1174 = dma.done.wait (%p1495_p0), [#allocation3], 1024  }
  0x51   : > { %1176 = vsyncadd (%p1495_p0), [#allocation3], 4294966272  ;;  %s304_s12 = sand.u32 1, %s1191_s22   ;;  %p1496_p6 = scmp.ne.s32.totalorder %s1490_s29, 0 }
  0x52   : > { %s856_s7 = sshll.u32 %s304_s12, 6  ;;  %s305_s16 = scalar_lea.sflag [#allocation6], %s304_s12 }
  0x53   : > { %s1392_s18 = scalar_lea.vmem [#allocation5], %s856_s7 }
  0x54   : > { %1178 = dma.done.wait (%p1496_p6), %s305_s16, 1024  }
  0x55   : > { %1180 = vsyncadd (%p1496_p6), %s305_s16, 4294966272  ;;  %p354_p7 = scmp.lt.s32.totalorder %s1199_s24, 2  ;;  %p861_p1 = scmp.ne.s32.totalorder %s1199_s24, 0 }
  0x56   : > { %v1213_v0 = vmov (!%p861_p1), 0.0  }
  0x57   : > { %s355_s30 = scalar_select %p354_p7, %s1199_s24, 2 }
  0x58   : > { %381 = sbr.rel (%p861_p1) target bundleno = 95 (0x5f), region = 56  ;;  %382 = vst [vmem:[#allocation7] sm:$0xff] (!%p861_p1), %v1213_v0  ;;  %383 = vst [vmem:[#allocation7 + $0x8] sm:$0xff] (!%p861_p1), %v1213_v0 }
  0x59   : > { %s888_s19 = sshll.u32 %s355_s30, 4  ;;  %s365_s8 = scalar_lea.vmem %s1481_s3, %s355_s30  ;;  %384 = vst [vmem:[#allocation7 + $0x10] sm:$0xff] (!%p861_p1), %v1213_v0  ;;  %385 = vst [vmem:[#allocation7 + $0x18] sm:$0xff] (!%p861_p1), %v1213_v0 }
  0x5a   : > { %s1406_s13 = scalar_lea.vmem %s1478_s0, %s888_s19  ;;  %s1411_s17 = scalar_lea.vmem %s1482_s4, %s888_s19 }
  0x5f PF: > { %v1049_v1 = vld [vmem:[#allocation2] sm:$0xff]   ;;  %v394_v2 = vlaneseq  ;;  %v1050_v3 = vld [vmem:[#allocation2 + $0x8] sm:$0xff]   ;;  %v1051_v5 = vld [vmem:[#allocation2 + $0x10] sm:$0xff]   ;;  %v1214_v36 = vmov 0   ;;  %p881_p4 = scmp.ne.s32.totalorder %s1199_s24, 2 }
  0x60   : > { %919 = vmatprep.subr.bf16.mxu0 %v1049_v1  ;;  %v1052_v7 = vld [vmem:[#allocation2 + $0x18] sm:$0xff]   ;;  %v390_v8 = vld [vmem:[%s365_s8] sm:$0x1]  ;;  %v1058_v14 = vld [vmem:[%s1392_s18 + $0x8] sm:$0xff]   ;;  %1038 = vset.pattern.permute.xlu0 %v1214_v36 }
  0x61   : > { %920 = vmatpush3.bf16.msra.mxu0 %v1049_v1  ;;  %v395_v4 = vshrl.u32 %v394_v2, 7  ;;  %v392_v9 = vpack.i.b16 %v390_v8, %v390_v8  ;;  %v1053_v10 = vld [vmem:[#allocation2 + $0x20] sm:$0xff]   ;;  %v1059_v17 = vld [vmem:[%s1392_s18 + $0x10] sm:$0xff]   ;;  %v1054_v20 = vld [vmem:[#allocation2 + $0x28] sm:$0xff]  }
  0x62   : > { %921 = vmatprep.subr.bf16.mxu0 %v1050_v3  ;;  %v386_v11 = vld [vmem:[%s1406_s13] sm:$0xf]  ;;  %v387_v15 = vld [vmem:[%s1406_s13 + $0x4] sm:$0xf]  ;;  %v1060_v22 = vld [vmem:[%s1392_s18 + $0x18] sm:$0xff]  }
  0x63   : > { %v396_v6 = vsub.s32 0, %v395_v4  ;;  %v1057_v12 = vld [vmem:[%s1392_s18] sm:$0xff]   ;;  %v1055_v23 = vld [vmem:[#allocation2 + $0x30] sm:$0xff]   ;;  %v388_v25 = vld [vmem:[%s1406_s13 + $0x8] sm:$0xf] }
  0x64   : > { %939 = vmatprep.subr.bf16.mxu1 %v1057_v12  ;;  %v1061_v24 = vld [vmem:[%s1392_s18 + $0x20] sm:$0xff]   ;;  %v389_v26 = vld [vmem:[%s1406_s13 + $0xc] sm:$0xf]  ;;  %v1056_v27 = vld [vmem:[#allocation2 + $0x38] sm:$0xff]  }
  0x65   : > { %922 = vmatpush3.bf16.msra.mxu0 %v1050_v3  ;;  %v397_v13 = vrot.slane %v392_v9, %v396_v6  ;;  %940 = vmatpush3.bf16.msra.mxu1 %v1057_v12  ;;  %v1062_v30 = vld [vmem:[%s1392_s18 + $0x28] sm:$0xff]   ;;  %v1063_v32 = vld [vmem:[%s1392_s18 + $0x30] sm:$0xff]   ;;  %v1064_v33 = vld [vmem:[%s1392_s18 + $0x38] sm:$0xff]  }
  0x66   : > { %923 = vmatprep.subr.bf16.mxu0 %v1051_v5  ;;  %941 = vmatprep.subr.bf16.mxu1 %v1058_v14  ;;  %v891_v34 = vld [vmem:[%s1411_s17] sm:$0xff]   ;;  %v898_v35 = vld [vmem:[%s1411_s17 + $0x8] sm:$0xff]   ;;  %v648_v54 = vld [vmem:[#allocation7 + $0x10] sm:$0xff] }
  0x67   : > { %v862_v16 = vcombine.low %v397_v13, %v397_v13  ;;  %v892_v37 = vunpack.c.l.bf16 %v891_v34  ;;  %v893_v38 = vunpack.c.h.bf16 %v891_v34  ;;  %v896_v39 = vunpack.c.l.bf16 %v898_v35  ;;  %v646_v58 = vld [vmem:[#allocation7] sm:$0xff]  ;;  %v649_v62 = vld [vmem:[#allocation7 + $0x18] sm:$0xff]  ;;  %v647_v2 = vld [vmem:[#allocation7 + $0x8] sm:$0xff] }
  0x68   : > { %v897_v40 = vunpack.c.h.bf16 %v898_v35  ;;  %v882_v8 = vld [vmem:[%s1483_s5] ss:$0 sm:$0xff] (!%p881_p4) }
  0x69   : > { %924 = vmatpush3.bf16.msra.mxu0 %v1051_v5  ;;  %v402_v18 = vmul.bf16 %v862_v16, %v386_v11  ;;  %v403_v19 = vmul.bf16 %v862_v16, %v387_v15  ;;  %942 = vmatpush3.bf16.msra.mxu1 %v1058_v14  ;;  %v404_v28 = vmul.bf16 %v862_v16, %v388_v25 }
  0x6a   : > { %925 = vmatprep.subr.bf16.mxu0 %v1052_v7  ;;  %943 = vmatprep.subr.bf16.mxu1 %v1059_v17  ;;  %v405_v29 = vmul.bf16 %v862_v16, %v389_v26  ;;  %v1039_v41 = vpack.i.bf16 %v893_v38, %v892_v37  ;;  %v1044_v42 = vpack.i.bf16 %v897_v40, %v896_v39 }
  0x6b   : > { %v863_v21 = vcombine.low %v402_v18, %v403_v19 }
  0x6c   : > { %v864_v31 = vcombine.low %v404_v28, %v405_v29  ;;  %1040 = vperm.xlu0 %1038, %v1039_v41  }
  0x6d   : > { %926 = vmatpush3.bf16.msra.mxu0 %v1052_v7  ;;  %935 = vmatprep.mubr.bf16.mxu0 %v863_v21 }
  0x6e   : > { %927 = vmatprep.subr.bf16.mxu0 %v1053_v10  ;;  %944 = vmatpush3.bf16.msra.mxu1 %v1059_v17 }
  0x6f   : > { %945 = vmatprep.subr.bf16.mxu1 %v1060_v22 }
  0x70   : > { %1045 = vperm.xlu0 %1038, %v1044_v42  }
  0x71   : > { %928 = vmatpush3.bf16.msra.mxu0 %v1053_v10 }
  0x72   : > { %929 = vmatprep.subr.bf16.mxu0 %v1054_v20  ;;  %946 = vmatpush3.bf16.msra.mxu1 %v1060_v22 }
  0x73   : > { %947 = vmatprep.subr.bf16.mxu1 %v1061_v24 }
  0x75   : > { %930 = vmatpush3.bf16.msra.mxu0 %v1054_v20 }
  0x76   : > { %931 = vmatprep.subr.bf16.mxu0 %v1055_v23  ;;  %948 = vmatpush3.bf16.msra.mxu1 %v1061_v24 }
  0x77   : > { %949 = vmatprep.subr.bf16.mxu1 %v1062_v30 }
  0x79   : > { %932 = vmatpush3.bf16.msra.mxu0 %v1055_v23 }
  0x7a   : > { %933 = vmatprep.subr.bf16.mxu0 %v1056_v27  ;;  %950 = vmatpush3.bf16.msra.mxu1 %v1062_v30 }
  0x7b   : > { %951 = vmatprep.subr.bf16.mxu1 %v1063_v32 }
  0x7d   : > { %934 = vmatpush3.bf16.msra.mxu0 %v1056_v27 }
  0x7e   : > { %952 = vmatpush3.bf16.msra.mxu1 %v1063_v32 }
  0x7f   : > { %953 = vmatprep.subr.bf16.mxu1 %v1064_v33 }
  0x80   : > { %936 = vmatmul.mubr.bf16.vlgmr.msra.gmra.mrb[0].mxu0 %v864_v31 }
  0x82   : > { %954 = vmatpush3.bf16.msra.mxu1 %v1064_v33 }
  0xeb   : > { %v1041_v49 = vpop.permute.xlu0 %1040 }
  0xec   : > { %v1042_v52 = vunpack.i.l.bf16 %v1041_v49  ;;  %v1043_v59 = vunpack.i.h.bf16 %v1041_v49 }
  0xef   : > { %v1046_v50 = vpop.permute.xlu0 %1045 }
  0xf0   : > { %v1047_v51 = vunpack.i.l.bf16 %v1046_v50  ;;  %v1048_v55 = vunpack.i.h.bf16 %v1046_v50 }
 0x153   : > { %v937_v43 = vpop.f32.mrb[0].mxu0 }
 0x154   : > { %v516_v44 = vpop.f32.mrb[1].mxu0 }
 0x155   : > { %v938_v45 = vpop.f32.mrb[2].mxu0 }
 0x156   : > { %v532_v46 = vpack.c.bf16 %v938_v45, %v937_v43  ;;  %v519_v47 = vpop.f32.mrb[3].mxu0 }
 0x157   : > { %v531_v48 = vpack.c.bf16 %v519_v47, %v516_v44 }
 0x159   : > { %955 = vmatprep.mubr.bf16.mxu1 %v531_v48 }
 0x15a   : > { %956 = vmatmul.mubr.bf16.vlgmr.msra.gmra.mrb[0].mxu1 %v532_v46 }
 0x22d   : > { %v957_v53 = vpop.f32.mrb[0].mxu1 }
 0x22e   : > { %v680_v56 = vmul.f32 %v1047_v51, %v957_v53  ;;  %v631_v57 = vpop.f32.mrb[1].mxu1 }
 0x22f   : > { %v678_v60 = vmul.f32 %v1042_v52, %v631_v57  ;;  %v958_v61 = vpop.f32.mrb[2].mxu1  ;;  %693 = sbr.rel (%p881_p4) target bundleno = 578 (0x242), region = 60 }
 0x230   : > { %v684_v63 = vadd.f32 %v680_v56, %v648_v54  ;;  %v681_v0 = vmul.f32 %v1048_v55, %v958_v61  ;;  %v634_v1 = vpop.f32.mrb[3].mxu1 }
 0x231   : > { %v682_v3 = vadd.f32 %v678_v60, %v646_v58  ;;  %v679_v4 = vmul.f32 %v1043_v59, %v634_v1 }
 0x232   : > { %688 = vst [vmem:[#allocation7 + $0x10] sm:$0xff] %v684_v63  ;;  %v685_v5 = vadd.f32 %v681_v0, %v649_v62 }
 0x233   : > { %686 = vst [vmem:[#allocation7] sm:$0xff] %v682_v3  ;;  %v683_v6 = vadd.f32 %v679_v4, %v647_v2 }
 0x234   : > { %689 = vst [vmem:[#allocation7 + $0x18] sm:$0xff] %v685_v5 }
 0x235   : > { %687 = vst [vmem:[#allocation7 + $0x8] sm:$0xff] %v683_v6 }
 0x239   : > { %v696_v12 = vld [vmem:[#allocation7 + $0x10] sm:$0xff] }
 0x23a   : > { %v694_v7 = vld [vmem:[#allocation7] sm:$0xff]  ;;  %v707_v14 = vadd.f32 %v882_v8, %v696_v12 }
 0x23b   : > { %v705_v10 = vadd.f32 %v882_v8, %v694_v7  ;;  %v697_v13 = vld [vmem:[#allocation7 + $0x18] sm:$0xff] }
 0x23c   : > { %v695_v9 = vld [vmem:[#allocation7 + $0x8] sm:$0xff]  ;;  %v708_v15 = vadd.f32 %v882_v8, %v697_v13  ;;  %v711_v18 = vmax.f32 %v707_v14, 0.0 }
 0x23d   : > { %v706_v11 = vadd.f32 %v882_v8, %v695_v9  ;;  %v709_v16 = vmax.f32 %v705_v10, 0.0 }
 0x23e   : > { %v712_v19 = vmax.f32 %v708_v15, 0.0  ;;  %715 = vst [vmem:[#allocation7 + $0x10] sm:$0xff] %v711_v18 }
 0x23f   : > { %v710_v17 = vmax.f32 %v706_v11, 0.0  ;;  %713 = vst [vmem:[#allocation7] sm:$0xff] %v709_v16 }
 0x240   : > { %716 = vst [vmem:[#allocation7 + $0x18] sm:$0xff] %v712_v19 }
 0x241   : > { %714 = vst [vmem:[#allocation7 + $0x8] sm:$0xff] %v710_v17 }
 0x242 PF: > { %p1434_p5 = scmp.eq.s32.totalorder %s847_s27, 2  ;;  %s1215_s7 = smov [#allocation7]  }
 0x243   : > { %s726_s16 = sshll.u32 %s1215_s7, 4  ;;  %s727_s16 = int_to_ptr.vmem [resolvable:$true] %s726_s16 }
 0x244   : > { %s1123_s18 = scalar_lea.vmem %s727_s16, 512  ;;  %p1130_p11 = scmp.lt.s32.totalorder %s727_s16, %s727_s16 }
 0x245   : > { %p1124_p8 = scmp.ne.s32.totalorder %s727_s16, %s1123_s18  ;;  %p1131_p13 = scmp.lt.s32.totalorder %s1123_s18, %s1123_s18 }
 0x247   : > { %p1125_p9 = pnand %p1124_p8, %p1434_p5  ;;  %p1132_p2 = por %p1131_p13, %p1130_p11 }
 0x249   : > { %p1126_p10 = pneg %p1125_p9 }
 0x24b   : > { %p1133_p3 = pnand %p1132_p2, %p1126_p10 }
 0x24d   : > { %1136 = shalt.err (!%p1133_p3)
}
 0x24e   : > { %s1137_s27 = scalar_lea.hbm %s1484_s6, 512 }
 0x24f   : > { %p1138_p12 = scmp.ne.s32.totalorder %s1484_s6, %s1137_s27  ;;  %p1143_p7 = scmp.lt.u32.totalorder %s1137_s27, %s1484_s6 }
 0x251   : > { %p1139_p0 = pnand %p1138_p12, %p1434_p5 }
 0x253   : > { %p1140_p6 = pneg %p1139_p0 }
 0x255   : > { %p1145_p1 = pnand %p1143_p7, %p1140_p6 }
 0x257   : > { %1148 = shalt.err (!%p1145_p1)
}
 0x258   : > { %s1216_s11 = smov 128   ;;  %s1217_s13 = smov 8  }
 0x259   : > { %966 = dma.vmem_to_hbm [thread:$0]  (%p1434_p5), %s727_s16, 512, %s1484_s6, [#allocation4], %s1216_s11, %s1216_s11, %s1217_s13  }
 0x25a   : > { %1182 = dma.done.wait (%p1434_p5), [#allocation4], 512  }
 0x25b   : > { %1184 = vsyncadd (%p1434_p5), [#allocation4], 4294966784 }
 0x25c PF: > { %s21_s26 = sadd.s32 1, %s1207_s26   ;;  %s1498_s21 = smov %s1191_s22 }
 0x25d   : > { %p18_p4 = scmp.ge.s32.totalorder %s21_s26, 5   ;;  %s1499_s22 = smov %s1195_s23 }
 0x25e   : > { %s1500_s23 = smov %s1341_s15  ;;  %s1501_s24 = smov %s1203_s25 }
 0x25f   : > { %s1502_s25 = smov %s1504_s10  ;;  %20 = sbr.rel (!%p18_p4) target bundleno = 6 (0x6), region = 104 }
 0x266   :  { %742 = vsyncpa [#allocation3], 1 }
 0x267   :  { %744 = vsyncpa [#allocation3 + $0x1], 1 }
 0x268   :  { %745 = vsyncpa [#allocation6], 1 }
 0x269   :  { %747 = vsyncpa [#allocation6 + $0x1], 1 }
 0x26a   :  { %748 = vsyncpa [#allocation4], 1 }
 0x26b   :  { %750 = vsyncpa [#allocation4 + $0x1], 1 }

</bundles_post_ra>
